<compile_context>
chip_gen: v7x
topology: tpu7x:2x2x1
jax: 0.10.0
libtpu: 0.0.40
codegen_flags: <defaults>
</compile_context>

<pallas_src>
import functools

import jax
import jax.numpy as jnp
from jax.experimental import pallas as pl
from jax.experimental.pallas import tpu as pltpu

TAU = 2.0      # LIFNode default tau
V_TH = 1.0     # LIFNode default v_threshold (v_reset = 0, initial v = 0)
BN_EPS = 1e-3  # BatchNorm2d eps from the module


def _vmem_limit_bytes():
    """Scoped VMEM budget, re-derived per TPU generation when possible."""
    try:
        phys = pltpu.get_tpu_info().vmem_capacity_bytes
        return int(min(phys // 2, 64 * 1024 * 1024))
    except Exception:
        return 32 * 1024 * 1024        # conservative, safe on v5e/v6e/v7x


def _make_kernels(H, W, Cin, ksize):
    WCin = W * Cin

    def conv_stats_kernel(x_ref, w_ref, conv_ref, stats_ref, slab_ref, acc_ref):
        # Pass 1, grid (N, k): image axis "parallel", dy-tap axis "arbitrary".
        #   x_ref:    (1, Hp, Wp*Cin) bf16  padded NHWC image (constant over dy)
        #   w_ref:    (1, k*W*Cin, W*Cout) bf16  per-dy block-diagonal weights
        #   conv_ref: (1, H, W*Cout) bf16   conv intermediate (written at dy==k-1)
        #   stats_ref:(1, 2, W*Cout) f32    per-image BN partial sums / sum-sq
        #   slab_ref: (k, H, k*W*Cin) bf16  VMEM cache of the dy row-slabs
        #   acc_ref:  (H, W*Cout) f32       MXU accumulator
        dy = pl.program_id(1)

        @pl.when(dy == 0)
        def _():
            # Hoisted tap construction: ONE f32 relayout of the padded image,
            # k unaligned lane windows concatenated once (K = k*W*Cin), then the
            # k dy row-slabs cached in VMEM for the whole image.
            x_img = x_ref[0].astype(jnp.float32)              # (Hp, Wp*Cin)
            xcat = jnp.concatenate(
                [x_img[:, dx * Cin: dx * Cin + WCin] for dx in range(ksize)],
                axis=1)                                       # (Hp, k*W*Cin)
            for d in range(ksize):                            # static unroll
                slab_ref[d] = xcat[d:d + H, :].astype(jnp.bfloat16)
            acc_ref[...] = jnp.zeros_like(acc_ref)

        # One deep MXU push per dy (K = k*W*Cin) instead of k*k shallow taps.
        acc_ref[...] += jnp.dot(slab_ref[dy], w_ref[0],
                                preferred_element_type=jnp.float32)

        @pl.when(dy == ksize - 1)
        def _():
            acc = acc_ref[...]
            conv_ref[0] = acc.astype(conv_ref.dtype)          # tiny bf16 intermediate
            # BN partials written row-wise (no concat relayout).
            stats_ref[0, 0:1, :] = jnp.sum(acc, axis=0, keepdims=True)
            stats_ref[0, 1:2, :] = jnp.sum(acc * acc, axis=0, keepdims=True)

    def bn_lif_kernel(conv_ref, sb_ref, o_ref):
        # Pass 2: pure elementwise BN affine + LIF threshold (no conv recompute).
        sb = sb_ref[...]                                      # (2, W*Cout) f32
        y = conv_ref[0].astype(jnp.float32) * sb[0:1, :] + sb[1:2, :]
        v = y * (1.0 / TAU)                                   # membrane charge from v=0
        o_ref[0] = (v >= V_TH).astype(o_ref.dtype)            # Heaviside (ATan is bwd-only)

    return conv_stats_kernel, bn_lif_kernel


def base_conv_snn_forward(x_nchw, w_pt, gamma, beta, *, ksize, stride):
    """Forward pass of BaseConvSNN. Only the stride=1 / groups=1 / bias=False path."""
    assert stride == 1, "only stride=1 implemented for this synthetic kernel"
    # TODO(synk): stride>1 / groups>1 / conv-bias variants of the module are not implemented.
    N, Cin, H, W = x_nchw.shape
    Cout = w_pt.shape[0]
    pad = (ksize - 1) // 2
    Hp, Wp = H + 2 * pad, W + 2 * pad
    WCin, WCout = W * Cin, W * Cout
    KK = ksize * WCin

    # ---- boundary glue (one fused XLA pass): NCHW -> padded NHWC bf16, lanes = x*Cin+c
    # TODO(synk): if the surrounding model runs NHWC/bf16 natively, this entry
    # transpose/pad/cast and the exit NCHW transpose disappear entirely; at this
    # tiny size they dominate end-to-end wall-clock.
    x = jnp.transpose(x_nchw, (0, 2, 3, 1))
    xp = jnp.pad(x, ((0, 0), (pad, pad), (pad, pad), (0, 0)))
    xp = xp.reshape(N, Hp, Wp * Cin).astype(jnp.bfloat16)                  # (N, Hp, Wp*Cin)

    # PyTorch weight (Cout, Cin, kh, kw) -> per-dy weights with the k dx taps folded
    # into the contraction and W spatial columns expanded block-diagonally so the
    # output stays 128-lane dense: (k, k*W*Cin, W*Cout).
    # TODO(synk): for large W/Cin/Cout group only g = ceil(128/Cout) spatial columns
    # per tile instead of all W (k^2*W^2*Cin*Cout VMEM and W-fold redundant MACs do
    # not scale); with W=16, Cout=8 here g == W so the layouts coincide.
    wt = jnp.transpose(w_pt, (2, 3, 1, 0)).astype(jnp.float32)             # (kh, kw, Cin, Cout)
    eye = jnp.eye(W, dtype=jnp.float32)
    wcat = jnp.einsum('ij,yxcd->yxicjd', eye, wt).reshape(ksize, KK, WCout)
    wcat = wcat.astype(jnp.bfloat16)

    conv_stats_kernel, bn_lif_kernel = _make_kernels(H, W, Cin, ksize)
    vmem_limit = _vmem_limit_bytes()

    # ---- Pallas pass 1: conv (k lane-dense MXU pushes) + bf16 intermediate + BN partials
    # grid (N, k): image axis parallel (feeds v7x's 2 TCs), dy axis arbitrary so each
    # core gets k pipelined steps per image (weight-slab prefetch overlaps compute).
    # TODO(synk): for larger N, process several images per grid step (bigger matmul M)
    # and consider Buffered(1) on the weight once it grows past ~MiB scale.
    conv_bf16, stats = pl.pallas_call(
        conv_stats_kernel,
        out_shape=(jax.ShapeDtypeStruct((N, H, WCout), jnp.bfloat16),
                   jax.ShapeDtypeStruct((N, 2, WCout), jnp.float32)),
        grid=(N, ksize),
        in_specs=[pl.BlockSpec((1, Hp, Wp * Cin), lambda n, d: (n, 0, 0)),
                  pl.BlockSpec((1, KK, WCout), lambda n, d: (d, 0, 0))],
        out_specs=[pl.BlockSpec((1, H, WCout), lambda n, d: (n, 0, 0)),
                   pl.BlockSpec((1, 2, WCout), lambda n, d: (n, 0, 0))],
        scratch_shapes=[pltpu.VMEM((ksize, H, KK), jnp.bfloat16),
                        pltpu.VMEM((H, WCout), jnp.float32)],
        compiler_params=pltpu.CompilerParams(
            dimension_semantics=("parallel", "arbitrary"),
            vmem_limit_bytes=vmem_limit),
    )(xp, wcat)

    # ---- tiny XLA fold: per-image partials -> train-mode BN scale/bias (fused operand)
    # TODO(synk): E[x^2]-E[x]^2 is cancellation-prone for very large N*H*W; switch to a
    # mean-subtracted / Welford accumulation if shapes grow.
    sums = stats.reshape(N, 2, W, Cout).sum(axis=(0, 2))     # (2, Cout)
    count = float(N * H * W)
    mean = sums[0] / count
    var = jnp.maximum(sums[1] / count - mean * mean, 0.0)    # biased variance
    scale = gamma.astype(jnp.float32) * jax.lax.rsqrt(var + BN_EPS)
    bias = beta.astype(jnp.float32) - mean * scale
    sb = jnp.stack([jnp.tile(scale, W), jnp.tile(bias, W)], axis=0)  # (2, W*Cout)

    # ---- Pallas pass 2: pure elementwise BN affine + LIF spike (lane-dense bf16 store)
    # TODO(synk): on single-TC chips (v5e/v6e) passes 1+2 could fuse into one phase-major
    # pallas_call; kept separate so the image axis stays parallel on v7x.
    out = pl.pallas_call(
        bn_lif_kernel,
        out_shape=jax.ShapeDtypeStruct((N, H, WCout), jnp.bfloat16),
        grid=(N,),
        in_specs=[pl.BlockSpec((1, H, WCout), lambda n: (n, 0, 0)),
                  pl.BlockSpec((2, WCout), lambda n: (0, 0))],
        out_specs=pl.BlockSpec((1, H, WCout), lambda n: (n, 0, 0)),
        compiler_params=pltpu.CompilerParams(
            dimension_semantics=("parallel",),
            vmem_limit_bytes=vmem_limit),
    )(conv_bf16, sb)

    # Spikes are exactly 0/1 in bf16; keep bf16 through the exit transpose (halves
    # writeback) and let the consumer upcast only if it needs f32.
    out = out.reshape(N, H, W, Cout)
    return jnp.transpose(out, (0, 3, 1, 2))                  # NCHW, bf16


def reference_forward(x_nchw, w_pt, gamma, beta, *, ksize, stride):
    """Pure-JAX f32 reference of the same forward pass (sanity check)."""
    pad = (ksize - 1) // 2
    y = jax.lax.conv_general_dilated(
        x_nchw.astype(jnp.float32), w_pt.astype(jnp.float32),
        window_strides=(stride, stride),
        padding=((pad, pad), (pad, pad)),
        dimension_numbers=("NCHW", "OIHW", "NCHW"))
    mean = jnp.mean(y, axis=(0, 2, 3), keepdims=True)
    var = jnp.mean((y - mean) ** 2, axis=(0, 2, 3), keepdims=True)
    yn = (y - mean) / jnp.sqrt(var + BN_EPS)
    yn = yn * gamma.reshape(1, -1, 1, 1) + beta.reshape(1, -1, 1, 1)
    return (yn / TAU >= V_TH).astype(jnp.float32)


if __name__ == "__main__":
    # Small shapes consistent with the module: NCHW input.
    N, Cin, Cout, H, W = 2, 4, 8, 16, 16
    ksize, stride = 3, 1

    key = jax.random.PRNGKey(0)
    kx, kw = jax.random.split(key, 2)
    x = jax.random.normal(kx, (N, Cin, H, W), dtype=jnp.float32)

    # Deterministic parameter init (shapes per Conv2d / BatchNorm2d __init__).
    fan_in = Cin * ksize * ksize
    bound = 1.0 / (fan_in ** 0.5)
    w = jax.random.uniform(kw, (Cout, Cin, ksize, ksize),
                           minval=-bound, maxval=bound, dtype=jnp.float32)
    gamma = jnp.ones((Cout,), dtype=jnp.float32)   # BatchNorm2d default weight
    beta = jnp.zeros((Cout,), dtype=jnp.float32)   # BatchNorm2d default bias
    # TODO(synk): multi-step (T-dim) spiking mode / stateful membrane carry across
    # calls is not modeled; this is the single-step forward from the reset state.

    fwd = jax.jit(functools.partial(base_conv_snn_forward, ksize=ksize, stride=stride))
    out = jax.block_until_ready(fwd(x, w, gamma, beta))
    ref = jax.block_until_ready(
        reference_forward(x, w, gamma, beta, ksize=ksize, stride=stride))

    assert out.shape == (N, Cout, H, W)
    # Spikes are binary; bf16 matmul inputs / bf16 intermediate can flip a handful of
    # threshold-boundary elements vs. the f32 reference, so gate on flip fraction.
    out_f32 = out.astype(jnp.float32)
    mismatch = float(jnp.mean(jnp.abs(out_f32 - ref)))
    assert mismatch < 5e-3, f"spike mismatch fraction too high: {mismatch}"

    print("KERNEL_OK")
</pallas_src>

<mosaic_0001>
module attributes {stable_mosaic.version = 11 : i64} {
  func.func @conv_stats_kernel(%arg0: i32, %arg1: i32, %arg2: memref<1x18x72xbf16, #tpu.memory_space<vmem>>, %arg3: memref<1x192x128xbf16, #tpu.memory_space<vmem>>, %arg4: memref<1x16x128xbf16, #tpu.memory_space<vmem>>, %arg5: memref<1x2x128xf32, #tpu.memory_space<vmem>>, %arg6: memref<3x16x192xbf16, #tpu.memory_space<vmem>>, %arg7: memref<16x128xf32, #tpu.memory_space<vmem>>) attributes {dimension_semantics = [#tpu.dimension_semantics<parallel>, #tpu.dimension_semantics<arbitrary>], iteration_bounds = array<i64: 2, 3>, scalar_prefetch = 0 : i64, scratch_operands = 2 : i64, tpu.core_type = #tpu.core_type<tc>, window_params = [{transform_indices = @transform_0, window_bounds = array<i64: 1, 18, 72>}, {transform_indices = @transform_1, window_bounds = array<i64: 1, 192, 128>}, {transform_indices = @transform_2, window_bounds = array<i64: 1, 16, 128>}, {transform_indices = @transform_3, window_bounds = array<i64: 1, 2, 128>}]} {
    %c0_i32 = arith.constant 0 : i32
    %0 = arith.cmpi eq, %arg1, %c0_i32 : i32
    %1 = arith.extui %0 : i1 to i32
    %c0_i32_0 = arith.constant 0 : i32
    %2 = arith.cmpi ne, %1, %c0_i32_0 : i32
    scf.if %2 {
      %c0_10 = arith.constant 0 : index
      %c0_11 = arith.constant 0 : index
      %c0_12 = arith.constant 0 : index
      %15 = vector.load %arg2[%c0_10, %c0_11, %c0_12] : memref<1x18x72xbf16, #tpu.memory_space<vmem>>, vector<1x18x72xbf16>
      %16 = vector.shape_cast %15 : vector<1x18x72xbf16> to vector<18x72xbf16>
      %17 = arith.extf %16 : vector<18x72xbf16> to vector<18x72xf32>
      %18 = vector.extract_strided_slice %17 {offsets = [0, 0], sizes = [18, 64], strides = [1, 1]} : vector<18x72xf32> to vector<18x64xf32>
      %19 = vector.extract_strided_slice %17 {offsets = [0, 4], sizes = [18, 64], strides = [1, 1]} : vector<18x72xf32> to vector<18x64xf32>
      %20 = vector.extract_strided_slice %17 {offsets = [0, 8], sizes = [18, 64], strides = [1, 1]} : vector<18x72xf32> to vector<18x64xf32>
      %21 = tpu.concatenate %18, %19, %20 in 1 : vector<18x64xf32>, vector<18x64xf32>, vector<18x64xf32> -> vector<18x192xf32>
      %22 = vector.extract_strided_slice %21 {offsets = [0, 0], sizes = [16, 192], strides = [1, 1]} : vector<18x192xf32> to vector<16x192xf32>
      %23 = arith.truncf %22 : vector<16x192xf32> to vector<16x192xbf16>
      %c0_13 = arith.constant 0 : index
      %c0_14 = arith.constant 0 : index
      %c0_15 = arith.constant 0 : index
      %24 = vector.load %arg6[%c0_13, %c0_14, %c0_15] : memref<3x16x192xbf16, #tpu.memory_space<vmem>>, vector<1x16x192xbf16>
      %25 = vector.shape_cast %24 : vector<1x16x192xbf16> to vector<16x192xbf16>
      %26 = vector.shape_cast %23 : vector<16x192xbf16> to vector<1x16x192xbf16>
      tpu.vector_store %arg6[%c0_13, %c0_14, %c0_15], %26 {strides = array<i32>} : memref<3x16x192xbf16, #tpu.memory_space<vmem>>, vector<1x16x192xbf16>,
      %27 = vector.extract_strided_slice %21 {offsets = [1, 0], sizes = [16, 192], strides = [1, 1]} : vector<18x192xf32> to vector<16x192xf32>
      %28 = arith.truncf %27 : vector<16x192xf32> to vector<16x192xbf16>
      %c1 = arith.constant 1 : index
      %c0_16 = arith.constant 0 : index
      %c0_17 = arith.constant 0 : index
      %29 = vector.load %arg6[%c1, %c0_16, %c0_17] : memref<3x16x192xbf16, #tpu.memory_space<vmem>>, vector<1x16x192xbf16>
      %30 = vector.shape_cast %29 : vector<1x16x192xbf16> to vector<16x192xbf16>
      %31 = vector.shape_cast %28 : vector<16x192xbf16> to vector<1x16x192xbf16>
      tpu.vector_store %arg6[%c1, %c0_16, %c0_17], %31 {strides = array<i32>} : memref<3x16x192xbf16, #tpu.memory_space<vmem>>, vector<1x16x192xbf16>,
      %32 = vector.extract_strided_slice %21 {offsets = [2, 0], sizes = [16, 192], strides = [1, 1]} : vector<18x192xf32> to vector<16x192xf32>
      %33 = arith.truncf %32 : vector<16x192xf32> to vector<16x192xbf16>
      %c2 = arith.constant 2 : index
      %c0_18 = arith.constant 0 : index
      %c0_19 = arith.constant 0 : index
      %34 = vector.load %arg6[%c2, %c0_18, %c0_19] : memref<3x16x192xbf16, #tpu.memory_space<vmem>>, vector<1x16x192xbf16>
      %35 = vector.shape_cast %34 : vector<1x16x192xbf16> to vector<16x192xbf16>
      %36 = vector.shape_cast %33 : vector<16x192xbf16> to vector<1x16x192xbf16>
      tpu.vector_store %arg6[%c2, %c0_18, %c0_19], %36 {strides = array<i32>} : memref<3x16x192xbf16, #tpu.memory_space<vmem>>, vector<1x16x192xbf16>,
      %cst_20 = arith.constant 0.000000e+00 : f32
      %37 = vector.broadcast %cst_20 : f32 to vector<16x128xf32>
      %c0_21 = arith.constant 0 : index
      %c0_22 = arith.constant 0 : index
      %38 = vector.load %arg7[%c0_21, %c0_22] : memref<16x128xf32, #tpu.memory_space<vmem>>, vector<16x128xf32>
      tpu.vector_store %arg7[%c0_21, %c0_22], %37 {strides = array<i32>} : memref<16x128xf32, #tpu.memory_space<vmem>>, vector<16x128xf32>,
    } else {
    }
    %c0 = arith.constant 0 : index
    %c0_1 = arith.constant 0 : index
    %3 = vector.load %arg7[%c0, %c0_1] : memref<16x128xf32, #tpu.memory_space<vmem>>, vector<16x128xf32>
    %4 = arith.index_cast %arg1 : i32 to index
    %c0_2 = arith.constant 0 : index
    %c0_3 = arith.constant 0 : index
    %5 = vector.load %arg6[%4, %c0_2, %c0_3] : memref<3x16x192xbf16, #tpu.memory_space<vmem>>, vector<1x16x192xbf16>
    %6 = vector.shape_cast %5 : vector<1x16x192xbf16> to vector<16x192xbf16>
    %c0_4 = arith.constant 0 : index
    %c0_5 = arith.constant 0 : index
    %c0_6 = arith.constant 0 : index
    %7 = vector.load %arg3[%c0_4, %c0_5, %c0_6] : memref<1x192x128xbf16, #tpu.memory_space<vmem>>, vector<1x192x128xbf16>
    %8 = vector.shape_cast %7 : vector<1x192x128xbf16> to vector<192x128xbf16>
    %cst = arith.constant dense<0.000000e+00> : vector<16x128xf32>
    %9 = tpu.matmul %6, %8, %cst {dimension_numbers = #tpu.dot_dimension_numbers<[1], [0], [0], [1], [0, 0, 1, 1], [], []>} : vector<16x192xbf16>, vector<192x128xbf16>, vector<16x128xf32> -> vector<16x128xf32>
    %10 = arith.addf %3, %9 : vector<16x128xf32>
    %c0_7 = arith.constant 0 : index
    %c0_8 = arith.constant 0 : index
    %11 = vector.load %arg7[%c0_7, %c0_8] : memref<16x128xf32, #tpu.memory_space<vmem>>, vector<16x128xf32>
    tpu.vector_store %arg7[%c0_7, %c0_8], %10 {strides = array<i32>} : memref<16x128xf32, #tpu.memory_space<vmem>>, vector<16x128xf32>,
    %c2_i32 = arith.constant 2 : i32
    %12 = arith.cmpi eq, %arg1, %c2_i32 : i32
    %13 = arith.extui %12 : i1 to i32
    %c0_i32_9 = arith.constant 0 : i32
    %14 = arith.cmpi ne, %13, %c0_i32_9 : i32
    scf.if %14 {
      %c0_10 = arith.constant 0 : index
      %c0_11 = arith.constant 0 : index
      %15 = vector.load %arg7[%c0_10, %c0_11] : memref<16x128xf32, #tpu.memory_space<vmem>>, vector<16x128xf32>
      %16 = arith.truncf %15 : vector<16x128xf32> to vector<16x128xbf16>
      %c0_12 = arith.constant 0 : index
      %c0_13 = arith.constant 0 : index
      %c0_14 = arith.constant 0 : index
      %17 = vector.load %arg4[%c0_12, %c0_13, %c0_14] : memref<1x16x128xbf16, #tpu.memory_space<vmem>>, vector<1x16x128xbf16>
      %18 = vector.shape_cast %17 : vector<1x16x128xbf16> to vector<16x128xbf16>
      %19 = vector.shape_cast %16 : vector<16x128xbf16> to vector<1x16x128xbf16>
      tpu.vector_store %arg4[%c0_12, %c0_13, %c0_14], %19 {strides = array<i32>} : memref<1x16x128xbf16, #tpu.memory_space<vmem>>, vector<1x16x128xbf16>,
      %cst_15 = arith.constant dense<0.000000e+00> : vector<128xf32>
      %20 = vector.multi_reduction <add>, %15, %cst_15 [0] : vector<16x128xf32> to vector<128xf32>
      %21 = vector.shape_cast %20 : vector<128xf32> to vector<1x128xf32>
      %c0_16 = arith.constant 0 : index
      %c0_17 = arith.constant 0 : index
      %c0_18 = arith.constant 0 : index
      %22 = vector.load %arg5[%c0_16, %c0_17, %c0_18] : memref<1x2x128xf32, #tpu.memory_space<vmem>>, vector<1x1x128xf32>
      %23 = vector.shape_cast %22 : vector<1x1x128xf32> to vector<1x128xf32>
      %24 = vector.shape_cast %21 : vector<1x128xf32> to vector<1x1x128xf32>
      tpu.vector_store %arg5[%c0_16, %c0_17, %c0_18], %24 {strides = array<i32>} : memref<1x2x128xf32, #tpu.memory_space<vmem>>, vector<1x1x128xf32>,
      %25 = arith.mulf %15, %15 : vector<16x128xf32>
      %cst_19 = arith.constant dense<0.000000e+00> : vector<128xf32>
      %26 = vector.multi_reduction <add>, %25, %cst_19 [0] : vector<16x128xf32> to vector<128xf32>
      %27 = vector.shape_cast %26 : vector<128xf32> to vector<1x128xf32>
      %c0_20 = arith.constant 0 : index
      %c1 = arith.constant 1 : index
      %c0_21 = arith.constant 0 : index
      %28 = vector.load %arg5[%c0_20, %c1, %c0_21] : memref<1x2x128xf32, #tpu.memory_space<vmem>>, vector<1x1x128xf32>
      %29 = vector.shape_cast %28 : vector<1x1x128xf32> to vector<1x128xf32>
      %30 = vector.shape_cast %27 : vector<1x128xf32> to vector<1x1x128xf32>
      tpu.vector_store %arg5[%c0_20, %c1, %c0_21], %30 {strides = array<i32>} : memref<1x2x128xf32, #tpu.memory_space<vmem>>, vector<1x1x128xf32>,
    } else {
    }
    return
  }
  func.func @transform_0(%arg0: i32, %arg1: i32) -> (i32, i32, i32) {
    %c0_i32 = arith.constant 0 : i32
    %c0_i32_0 = arith.constant 0 : i32
    %c0_i32_1 = arith.constant 0 : i32
    return %arg0, %c0_i32, %c0_i32_0 : i32, i32, i32
  }
  func.func @transform_1(%arg0: i32, %arg1: i32) -> (i32, i32, i32) {
    %c0_i32 = arith.constant 0 : i32
    %c0_i32_0 = arith.constant 0 : i32
    %c0_i32_1 = arith.constant 0 : i32
    return %arg1, %c0_i32, %c0_i32_0 : i32, i32, i32
  }
  func.func @transform_2(%arg0: i32, %arg1: i32) -> (i32, i32, i32) {
    %c0_i32 = arith.constant 0 : i32
    %c0_i32_0 = arith.constant 0 : i32
    %c0_i32_1 = arith.constant 0 : i32
    return %arg0, %c0_i32, %c0_i32_0 : i32, i32, i32
  }
  func.func @transform_3(%arg0: i32, %arg1: i32) -> (i32, i32, i32) {
    %c0_i32 = arith.constant 0 : i32
    %c0_i32_0 = arith.constant 0 : i32
    %c0_i32_1 = arith.constant 0 : i32
    return %arg0, %c0_i32, %c0_i32_0 : i32, i32, i32
  }
}

module attributes {stable_mosaic.version = 11 : i64} {
  func.func @bn_lif_kernel(%arg0: i32, %arg1: memref<1x16x128xbf16, #tpu.memory_space<vmem>>, %arg2: memref<2x128xf32, #tpu.memory_space<vmem>>, %arg3: memref<1x16x128xbf16, #tpu.memory_space<vmem>>) attributes {dimension_semantics = [#tpu.dimension_semantics<parallel>], iteration_bounds = array<i64: 2>, scalar_prefetch = 0 : i64, scratch_operands = 0 : i64, tpu.core_type = #tpu.core_type<tc>, window_params = [{transform_indices = @transform_0, window_bounds = array<i64: 1, 16, 128>}, {pipeline_mode = #tpu.pipeline_mode<synchronous>, transform_indices = @transform_1, window_bounds = array<i64: 2, 128>}, {transform_indices = @transform_2, window_bounds = array<i64: 1, 16, 128>}]} {
    %c0 = arith.constant 0 : index
    %c0_0 = arith.constant 0 : index
    %0 = vector.load %arg2[%c0, %c0_0] : memref<2x128xf32, #tpu.memory_space<vmem>>, vector<2x128xf32>
    %c0_1 = arith.constant 0 : index
    %c0_2 = arith.constant 0 : index
    %c0_3 = arith.constant 0 : index
    %1 = vector.load %arg1[%c0_1, %c0_2, %c0_3] : memref<1x16x128xbf16, #tpu.memory_space<vmem>>, vector<1x16x128xbf16>
    %2 = vector.shape_cast %1 : vector<1x16x128xbf16> to vector<16x128xbf16>
    %3 = arith.extf %2 : vector<16x128xbf16> to vector<16x128xf32>
    %4 = vector.extract_strided_slice %0 {offsets = [0, 0], sizes = [1, 128], strides = [1, 1]} : vector<2x128xf32> to vector<1x128xf32>
    %5 = vector.broadcast %4 : vector<1x128xf32> to vector<16x128xf32>
    %6 = arith.mulf %3, %5 : vector<16x128xf32>
    %7 = vector.extract_strided_slice %0 {offsets = [1, 0], sizes = [1, 128], strides = [1, 1]} : vector<2x128xf32> to vector<1x128xf32>
    %8 = vector.broadcast %7 : vector<1x128xf32> to vector<16x128xf32>
    %9 = arith.addf %6, %8 : vector<16x128xf32>
    %cst = arith.constant 5.000000e-01 : f32
    %10 = vector.broadcast %cst : f32 to vector<16x128xf32>
    %11 = arith.mulf %9, %10 : vector<16x128xf32>
    %cst_4 = arith.constant 1.000000e+00 : f32
    %12 = vector.broadcast %cst_4 : f32 to vector<16x128xf32>
    %13 = arith.cmpf oge, %11, %12 : vector<16x128xf32>
    %14 = arith.extui %13 : vector<16x128xi1> to vector<16x128xi32>
    %15 = arith.sitofp %14 : vector<16x128xi32> to vector<16x128xf32>
    %16 = arith.truncf %15 : vector<16x128xf32> to vector<16x128xbf16>
    %c0_5 = arith.constant 0 : index
    %c0_6 = arith.constant 0 : index
    %c0_7 = arith.constant 0 : index
    %17 = vector.load %arg3[%c0_5, %c0_6, %c0_7] : memref<1x16x128xbf16, #tpu.memory_space<vmem>>, vector<1x16x128xbf16>
    %18 = vector.shape_cast %17 : vector<1x16x128xbf16> to vector<16x128xbf16>
    %19 = vector.shape_cast %16 : vector<16x128xbf16> to vector<1x16x128xbf16>
    tpu.vector_store %arg3[%c0_5, %c0_6, %c0_7], %19 {strides = array<i32>} : memref<1x16x128xbf16, #tpu.memory_space<vmem>>, vector<1x16x128xbf16>,
    return
  }
  func.func @transform_0(%arg0: i32) -> (i32, i32, i32) {
    %c0_i32 = arith.constant 0 : i32
    %c0_i32_0 = arith.constant 0 : i32
    %c0_i32_1 = arith.constant 0 : i32
    return %arg0, %c0_i32, %c0_i32_0 : i32, i32, i32
  }
  func.func @transform_1(%arg0: i32) -> (i32, i32) {
    %c0_i32 = arith.constant 0 : i32
    %c0_i32_0 = arith.constant 0 : i32
    %c0_i32_1 = arith.constant 0 : i32
    return %c0_i32, %c0_i32_0 : i32, i32
  }
  func.func @transform_2(%arg0: i32) -> (i32, i32, i32) {
    %c0_i32 = arith.constant 0 : i32
    %c0_i32_0 = arith.constant 0 : i32
    %c0_i32_1 = arith.constant 0 : i32
    return %arg0, %c0_i32, %c0_i32_0 : i32, i32, i32
  }
}

</mosaic_0001>

<bundles_post_ra>
// kernel: tile.13
= control target key start
LH: loop header
LB: loop body
LE: loop exit
PB: predicated region body
PF: predicated region fallthrough
CT: control target
= control target key end

     0   :  { %s28_s0 = inlined_call_operand.vmem [shape: f32[8], index: 0, kind: input, shape index: {}]   ;;  %s29_s1 = inlined_call_operand.vmem [shape: f32[16,8], index: 1, kind: output, shape index: {}]  }
   0x1   :  { %v4_v0 = vld [vmem:[%s28_s0] ss:$0 sm:$0xff] }
   0x2   :  { %5 = vst [vmem:[%s29_s1] sm:$0xff] %v4_v0  ;;  %8 = vst [vmem:[%s29_s1 + $0x8] sm:$0xff] %v4_v0 }

// kernel: tile.18
= control target key start
LH: loop header
LB: loop body
LE: loop exit
PB: predicated region body
PF: predicated region fallthrough
CT: control target
= control target key end

     0   :  { %s131_s10 = smov 120   ;;  %s132_s11 = smov 104   ;;  %vm3_vm0 = vcmask 64512   ;;  %vm9_vm1 = vcmask 1048512   ;;  %vm15_vm2 = vcmask 982912   ;;  %vm21_vm3 = vcmask 917312   ;;  %s207_s0 = inlined_call_operand.vmem [shape: f32[16,8], index: 0, kind: input, shape index: {}]   ;;  %s208_s1 = inlined_call_operand.vmem [shape: f32[1,128], index: 1, kind: output, shape index: {}]  }
   0x1   :  { %v101_v0 = vld [vmem:[%s207_s0 + $0xf] sm:$0x1]   ;;  %v103_v1 = vld [vmem:[%s207_s0 + $0xd] sm:$0x1]   ;;  %v102_v2 = vld [vmem:[%s207_s0 + $0xe] sm:$0x1]  }
   0x2   :  { %7 = vrot.lane.b32.xlu0 %v101_v0, %s131_s10  ;;  %19 = vrot.lane.b32.xlu1 %v103_v1, %s132_s11  ;;  %v104_v3 = vld [vmem:[%s207_s0 + $0xc] sm:$0x1]   ;;  %s133_s16 = smov 112   ;;  %s134_s17 = smov 96   ;;  %v105_v4 = vld [vmem:[%s207_s0 + $0xb] sm:$0x1]  }
   0x3   :  { %v106_v5 = vld [vmem:[%s207_s0 + $0xa] sm:$0x1]   ;;  %v2_v6 = vld [vmem:[%s207_s0] sm:$0x1]   ;;  %s135_s24 = smov 88   ;;  %s136_s25 = smov 80  }
   0x4   :  { %4 = vst.msk [vmem:[#allocation0] sm:$0x1] %vm3_vm0, %v2_v6   ;;  %v107_v7 = vld [vmem:[%s207_s0 + $0x9] sm:$0x1]   ;;  %v108_v8 = vld [vmem:[%s207_s0 + $0x8] sm:$0x1]  }
   0x5   :  { %s137_s30 = smov 72   ;;  %s138_s2 = smov 64   ;;  %v109_v9 = vld [vmem:[%s207_s0 + $0x7] sm:$0x1]   ;;  %v110_v10 = vld [vmem:[%s207_s0 + $0x6] sm:$0x1]  }
   0x6   :  { %13 = vrot.lane.b32.xlu0 %v102_v2, %s133_s16  ;;  %25 = vrot.lane.b32.xlu1 %v104_v3, %s134_s17  ;;  %s139_s7 = smov 56   ;;  %s140_s8 = smov 48   ;;  %v111_v11 = vld [vmem:[%s207_s0 + $0x5] sm:$0x1]   ;;  %v112_v12 = vld [vmem:[%s207_s0 + $0x4] sm:$0x1]  }
   0x7   :  { %s141_s13 = smov 40   ;;  %s142_s14 = smov 32   ;;  %v113_v13 = vld [vmem:[%s207_s0 + $0x3] sm:$0x1]   ;;  %v114_v14 = vld [vmem:[%s207_s0 + $0x2] sm:$0x1]  }
   0x8   :  { %s143_s19 = smov 24   ;;  %s144_s20 = smov 16   ;;  %v115_v15 = vld [vmem:[%s207_s0 + $0x1] sm:$0x1]   ;;  %vm27_vm4 = vcmask 851712   ;;  %vm33_vm5 = vcmask 786112  }
   0x9   :  { %s145_s0 = smov 8   ;;  %vm39_vm6 = vcmask 720512   ;;  %vm45_vm7 = vcmask 654912   ;;  %vm51_vm8 = vcmask 589312   ;;  %vm57_vm9 = vcmask 523712  }
   0xa   :  { %31 = vrot.lane.b32.xlu0 %v105_v4, %s135_s24  ;;  %37 = vrot.lane.b32.xlu1 %v106_v5, %s136_s25  ;;  %vm63_vm10 = vcmask 458112   ;;  %vm69_vm11 = vcmask 392512   ;;  %vm75_vm12 = vcmask 326912   ;;  %vm81_vm13 = vcmask 261312  }
   0xb   :  { %vm87_vm14 = vcmask 195712   ;;  %vm93_vm15 = vcmask 130112  }
   0xe   :  { %43 = vrot.lane.b32.xlu0 %v107_v7, %s137_s30  ;;  %49 = vrot.lane.b32.xlu1 %v108_v8, %s138_s2 }
  0x12   :  { %55 = vrot.lane.b32.xlu0 %v109_v9, %s139_s7  ;;  %61 = vrot.lane.b32.xlu1 %v110_v10, %s140_s8 }
  0x16   :  { %67 = vrot.lane.b32.xlu0 %v111_v11, %s141_s13  ;;  %73 = vrot.lane.b32.xlu1 %v112_v12, %s142_s14 }
  0x1a   :  { %79 = vrot.lane.b32.xlu0 %v113_v13, %s143_s19  ;;  %85 = vrot.lane.b32.xlu1 %v114_v14, %s144_s20 }
  0x1e   :  { %91 = vrot.lane.b32.xlu0 %v115_v15, %s145_s0 }
  0x74   :  { %v8_v16 = vpop.permute.xlu0 %7   ;;  %v20_v17 = vpop.permute.xlu1 %19  }
  0x75   :  { %10 = vst.msk [vmem:[#allocation0] sm:$0x1] %vm9_vm1, %v8_v16  }
  0x78   :  { %v14_v18 = vpop.permute.xlu0 %13   ;;  %v26_v19 = vpop.permute.xlu1 %25  }
  0x79   :  { %16 = vst.msk [vmem:[#allocation0] sm:$0x1] %vm15_vm2, %v14_v18  }
  0x7a   :  { %22 = vst.msk [vmem:[#allocation0] sm:$0x1] %vm21_vm3, %v20_v17  }
  0x7b   :  { %28 = vst.msk [vmem:[#allocation0] sm:$0x1] %vm27_vm4, %v26_v19  }
  0x7c   :  { %v32_v20 = vpop.permute.xlu0 %31   ;;  %v38_v21 = vpop.permute.xlu1 %37  }
  0x7d   :  { %34 = vst.msk [vmem:[#allocation0] sm:$0x1] %vm33_vm5, %v32_v20  }
  0x7e   :  { %40 = vst.msk [vmem:[#allocation0] sm:$0x1] %vm39_vm6, %v38_v21  }
  0x80   :  { %v44_v22 = vpop.permute.xlu0 %43   ;;  %v50_v23 = vpop.permute.xlu1 %49  }
  0x81   :  { %46 = vst.msk [vmem:[#allocation0] sm:$0x1] %vm45_vm7, %v44_v22  }
  0x82   :  { %52 = vst.msk [vmem:[#allocation0] sm:$0x1] %vm51_vm8, %v50_v23  }
  0x84   :  { %v56_v24 = vpop.permute.xlu0 %55   ;;  %v62_v25 = vpop.permute.xlu1 %61  }
  0x85   :  { %58 = vst.msk [vmem:[#allocation0] sm:$0x1] %vm57_vm9, %v56_v24  }
  0x86   :  { %64 = vst.msk [vmem:[#allocation0] sm:$0x1] %vm63_vm10, %v62_v25  }
  0x88   :  { %v68_v26 = vpop.permute.xlu0 %67   ;;  %v74_v27 = vpop.permute.xlu1 %73  }
  0x89   :  { %70 = vst.msk [vmem:[#allocation0] sm:$0x1] %vm69_vm11, %v68_v26  }
  0x8a   :  { %76 = vst.msk [vmem:[#allocation0] sm:$0x1] %vm75_vm12, %v74_v27  }
  0x8c   :  { %v80_v28 = vpop.permute.xlu0 %79   ;;  %v86_v29 = vpop.permute.xlu1 %85  }
  0x8d   :  { %82 = vst.msk [vmem:[#allocation0] sm:$0x1] %vm81_vm13, %v80_v28  }
  0x8e   :  { %88 = vst.msk [vmem:[#allocation0] sm:$0x1] %vm87_vm14, %v86_v29  }
  0x90   :  { %v92_v30 = vpop.permute.xlu0 %91  }
  0x91   :  { %94 = vst.msk [vmem:[#allocation0] sm:$0x1] %vm93_vm15, %v92_v30  }
  0x98   :  { %v98_v31 = vld [vmem:[#allocation0] sm:$0x1] }
  0x99   :  { %100 = vst [vmem:[%s208_s1] sm:$0x1] %v98_v31 }

// kernel: base_conv_snn_forward.3
= control target key start
LH: loop header
LB: loop body
LE: loop exit
PB: predicated region body
PF: predicated region fallthrough
CT: control target
= control target key end

     0   :  { %s293_s9 = smov 0   ;;  %s313_s0 = inlined_call_operand.vmem [shape: bf16[2,16,128], index: 0, kind: input, shape index: {}]   ;;  %s314_s1 = inlined_call_operand.vmem [shape: f32[2,128], index: 1, kind: input, shape index: {}]   ;;  %s315_s2 = inlined_call_operand.vmem [shape: bf16[2,16,128], index: 2, kind: output, shape index: {}]  }
   0x1 LB: > { %s234_s10 = sadd.s32 4294967295, %s275_s9   ;;  %p238_p0 = scmp.ge.s32.totalorder %s275_s9, 1  ;;  %s275_s9 = sphi %s293_s9, %s12_s9  }
   0x2   : > { %p112_p1 = scmp.lt.s32.totalorder %s275_s9, 3 }
   0x4   : > { %p113_p2 = pnand %p238_p0, %p112_p1 }
   0x5   : > { %p134_p3 = scmp.lt.s32.totalorder (!%p113_p2), %s234_s10, 1  ;;  %v149_v0 = vlaneseq (!%p113_p2)  ;;  %v144_v2 = vld [vmem:[%s314_s1] sm:$0x3] (!%p113_p2)  ;;  %v277_v16 = vmov (!%p113_p2), 0.0  }
   0x6   : > { %116 = sbr.rel (%p113_p2) target bundleno = 30 (0x1e), region = 28 }
   0x7   : > { %v150_v1 = vshrl.u32 (!%p113_p2), %v149_v0, 7 }
   0x9   : > { %v151_v3 = vsub.s32 (!%p113_p2), 0, %v150_v1  ;;  %v157_v4 = vsub.s32 (!%p113_p2), 1, %v150_v1 }
   0xb   : > { %v152_v6 = vrot.slane (!%p113_p2), %v144_v2, %v151_v3  ;;  %v158_v9 = vrot.slane (!%p113_p2), %v144_v2, %v157_v4 }
   0xd   : > { %s317_s10 = smov (!%p134_p3, %s234_s10), 1 }
   0xe   : > { %s249_s13 = sshll.u32 %s317_s10, 3 }
   0xf   : > { %s138_s16 = scalar_lea.vmem %s313_s0, %s249_s13  ;;  %s143_s19 = scalar_lea.vmem %s315_s2, %s249_s13 }
  0x10   : > { %v254_v5 = vld [vmem:[%s138_s16] sm:$0xff]  }
  0x11   : > { %v255_v7 = vunpack.c.l.bf16 %v254_v5  ;;  %v256_v8 = vunpack.c.h.bf16 %v254_v5 }
  0x13   : > { %v153_v10 = vmul.f32 %v255_v7, %v152_v6  ;;  %v154_v11 = vmul.f32 %v256_v8, %v152_v6 }
  0x15   : > { %v159_v12 = vadd.f32 %v158_v9, %v153_v10  ;;  %v160_v13 = vadd.f32 %v158_v9, %v154_v11 }
  0x17   : > { %v161_v14 = vmul.f32 0.5, %v159_v12  ;;  %v162_v15 = vmul.f32 0.5, %v160_v13 }
  0x19   : > { %vm163_vm0 = vcmp.ge.f32.partialorder %v161_v14, 1.0  ;;  %vm164_vm1 = vcmp.ge.f32.partialorder %v162_v15, 1.0 }
  0x1a   : > { %v243_v17 = vsel %vm163_vm0, 1.0, %v277_v16  ;;  %v244_v18 = vsel %vm164_vm1, 1.0, %v277_v16 }
  0x1b   : > { %v258_v19 = vpack.c.bf16 %v244_v18, %v243_v17 }
  0x1d   : > { %259 = vst [vmem:[%s143_s19] sm:$0xff] %v258_v19  }
  0x1e PF: > { %s12_s9 = sadd.s32 1, %s275_s9  }
  0x1f   : > { %p9_p4 = scmp.ge.s32.totalorder %s12_s9, 4  }
  0x21   :  { %11 = sbr.rel (!%p9_p4) target bundleno = 1 (0x1), region = 58 }

// kernel: base_conv_snn_forward.2
= control target key start
LH: loop header
LB: loop body
LE: loop exit
PB: predicated region body
PF: predicated region fallthrough
CT: control target
= control target key end

     0   :  { %s777_s12 = smov 0   ;;  %s779_s13 = smov 0   ;;  %s870_s0 = inlined_call_operand.vmem [shape: bf16[2,18,72], index: 0, kind: input, shape index: {}]   ;;  %s871_s1 = inlined_call_operand.vmem [shape: bf16[3,192,128], index: 1, kind: input, shape index: {}]   ;;  %s872_s2 = inlined_call_operand.vmem [shape: bf16[2,16,128], index: 2, kind: output, shape index: {0}]   ;;  %s873_s3 = inlined_call_operand.vmem [shape: f32[2,2,128], index: 3, kind: output, shape index: {1}]  }
   0x1   :  { %s781_s14 = smov 0   ;;  %s783_s15 = smov 0  }
   0x2   :  { %s785_s16 = smov 0  }
   0x3 LB: > { %s23_s17 = sadd.s32 1, %s743_s14  ;;  %s26_s18 = sadd.s32 1, %s747_s15  ;;  %s751_s16 = sphi %s785_s16, %s14_s16   ;;  %s747_s15 = sphi %s783_s15, %s877_s15   ;;  %s743_s14 = sphi %s781_s14, %s876_s14   ;;  %s739_s13 = sphi %s779_s13, %s875_s13   ;;  %s735_s12 = sphi %s777_s12, %s874_s12  }
   0x4   : > { %p24_p0 = scmp.ge.s32.totalorder %s23_s17, 3  ;;  %p605_p1 = scmp.ge.s32.totalorder %s751_s16, 1 }
   0x5   : > { %p162_p2 = scmp.lt.s32.totalorder %s751_s16, 7 }
   0x6   : > { %s879_s17 = smov (%p24_p0, %s23_s17), 0  ;;  %s881_s18 = smov (!%p24_p0, %s26_s18), %s747_s15 }
   0x7   : > { %p163_p3 = pnand %p605_p1, %p162_p2  ;;  %p28_p4 = scmp.ge.s32.totalorder %s881_s18, 2 }
   0x8   : > { %p195_p5 = scmp.lt.s32.totalorder (!%p163_p3), %s739_s13, 1  ;;  %p200_p6 = scmp.lt.s32.totalorder (!%p163_p3), %s735_s12, 2 }
   0x9   : > { %s883_s18 = smov (%p28_p4, %s881_s18), 0  ;;  %166 = sbr.rel (%p163_p3) target bundleno = 447 (0x1bf), region = 28 }
   0xa   : > { %p611_p7 = scmp.ne.s32.totalorder (!%p163_p3), %s735_s12, 0 }
  0x10   : > { %s885_s13 = smov (!%p195_p5, %s739_s13), 1  ;;  %218 = sbr.rel (%p611_p7) target bundleno = 157 (0x9d), region = 32 }
  0x11   : > { %s201_s19 = scalar_select %p200_p6, %s735_s12, 2 }
  0x12   : > { %s645_s20 = smul.u32 12, %s885_s13  ;;  %s632_s21 = sshll.u32 %s885_s13, 3  ;;  %v755_v6 = vmov (!%p611_p7), 0.0   ;;  %vm246_vm0 = vcmask (!%p611_p7), 523264   ;;  %vm290_vm1 = vcmask (!%p611_p7), 1046528  }
  0x13   : > { %s646_s22 = smul.u32 96, %s201_s19  ;;  %s814_s25 = scalar_lea.vmem %s872_s2, %s632_s21  ;;  %302 = vst [vmem:[#allocation3] sm:$0xff] (!%p611_p7), %v755_v6  ;;  %303 = vst [vmem:[#allocation3 + $0x8] sm:$0xff] (!%p611_p7), %v755_v6  ;;  %vm256_vm2 = vsmask.f32 (!%p611_p7), 7424 }
  0x14   : > { %s199_s28 = scalar_lea.vmem %s870_s0, %s645_s20  ;;  %s610_s29 = sshll.u32 %s885_s13, 1 }
  0x15   : > { %s822_s5 = scalar_lea.vmem %s871_s1, %s646_s22  ;;  %s827_s8 = scalar_lea.vmem %s873_s3, %s610_s29  ;;  %v637_v0 = vld [vmem:[%s199_s28] sm:$0xff] (!%p611_p7)   ;;  %v221_v1 = vld [vmem:[%s199_s28 + $0x8] sm:$0x1] (!%p611_p7) }
  0x16   : > { %v638_v2 = vunpack.c.l.bf16 (!%p611_p7), %v637_v0  ;;  %v639_v3 = vunpack.c.h.bf16 (!%p611_p7), %v637_v0  ;;  %v224_v4 = vunpack.c.l.bf16 (!%p611_p7), %v221_v1  ;;  %s753_s9 = smov (!%p611_p7), 60   ;;  %s754_s10 = smov (!%p611_p7), 120  }
  0x18   : > { %v691_v5 = vpack.i.bf16 %v639_v3, %v638_v2  ;;  %232 = vrot.lane.b32.xlu1 %v224_v4, %s753_s9 }
  0x1a   : > { %692 = vrot.lane.b32.xlu0 %v691_v5, %s753_s9 }
  0x1c   : > { %241 = vrot.lane.b32.xlu1 %v224_v4, %s754_s10 }
  0x1e   : > { %697 = vrot.lane.b32.xlu0 %v691_v5, %s754_s10 }
  0x8a   : > { %v233_v7 = vpop.permute.xlu1 %232 }
  0x8b   : > { %v249_v8 = vsel %vm246_vm0, %v224_v4, %v233_v7 }
  0x8c   : > { %v693_v9 = vpop.permute.xlu0 %692  ;;  %v254_v10 = vpack.c.bf16 %v249_v8, %v249_v8 }
  0x8d   : > { %v695_v11 = vunpack.i.h.bf16 %v693_v9  ;;  %v694_v12 = vunpack.i.l.bf16 %v693_v9 }
  0x8e   : > { %v242_v13 = vpop.permute.xlu1 %241  ;;  %v265_v18 = vshll.u32 %v254_v10, 16  ;;  %v292_v19 = vrot.slane %v254_v10, 1 }
  0x8f   : > { %v248_v14 = vsel %vm246_vm0, %v639_v3, %v695_v11  ;;  %v247_v15 = vsel %vm246_vm0, %v638_v2, %v694_v12  ;;  %v255_v16 = vpack.c.bf16 %v242_v13, %v242_v13 }
  0x90   : > { %v250_v17 = vpack.c.bf16 %v248_v14, %v247_v15  ;;  %v698_v20 = vpop.permute.xlu0 %697  ;;  %v267_v30 = vrot.slane %v265_v18, 1 }
  0x91   : > { %v700_v21 = vunpack.i.h.bf16 %v698_v20  ;;  %v699_v22 = vunpack.i.l.bf16 %v698_v20  ;;  %v277_v26 = vshll.u32 %v255_v16, 16  ;;  %v295_v27 = vrot.slane %v255_v16, 1 }
  0x92   : > { %252 = vst [vmem:[#allocation2] sm:$0xff] %v250_v17  ;;  %v260_v23 = vshll.u32 %v250_v17, 16  ;;  %v291_v24 = vrot.slane %v250_v17, 1  ;;  %v258_v28 = vshrl.u32 %v250_v17, 16 }
  0x93   : > { %v251_v25 = vpack.c.bf16 %v700_v21, %v699_v22  ;;  %v279_v37 = vrot.slane %v277_v26, 1 }
  0x94   : > { %v262_v29 = vrot.slane %v260_v23, 1  ;;  %v293_v31 = vsel %vm290_vm1, %v291_v24, %v292_v19 }
  0x95   : > { %300 = vst [vmem:[#allocation2 + $0x20] sm:$0xff] %v293_v31  ;;  %253 = vst.msk [vmem:[#allocation2 + $0x8] sm:$0xff] %vm246_vm0, %v251_v25  ;;  %v272_v32 = vshll.u32 %v251_v25, 16  ;;  %v294_v33 = vrot.slane %v251_v25, 1  ;;  %v270_v35 = vshrl.u32 %v251_v25, 16 }
  0x96   : > { %v263_v34 = vor.u32 %v262_v29, %v258_v28 }
  0x97   : > { %v274_v36 = vrot.slane %v272_v32, 1  ;;  %v296_v38 = vsel %vm290_vm1, %v294_v33, %v295_v27 }
  0x98   : > { %v268_v39 = vsel %vm256_vm2, %v263_v34, %v267_v30  ;;  %301 = vst.msk [vmem:[#allocation2 + $0x28] sm:$0xff] %vm246_vm0, %v296_v38 }
  0x99   : > { %284 = vst [vmem:[#allocation2 + $0x10] sm:$0xff] %v268_v39  ;;  %v275_v40 = vor.u32 %v274_v36, %v270_v35 }
  0x9b   : > { %v280_v41 = vsel %vm256_vm2, %v275_v40, %v279_v37 }
  0x9c   : > { %285 = vst.msk [vmem:[#allocation2 + $0x18] sm:$0xff] %vm246_vm0, %v280_v41 }
  0x9d PF: > { %v701_v42 = vld [vmem:[%s822_s5] sm:$0xff]   ;;  %v756_v43 = vmov 0   ;;  %v702_v44 = vld [vmem:[%s822_s5 + $0x8] sm:$0xff]   ;;  %v703_v45 = vld [vmem:[%s822_s5 + $0x10] sm:$0xff]   ;;  %s633_s11 = sshll.u32 %s735_s12, 4  ;;  %vm407_vm3 = vcmask 523264  }
  0x9e   : > { %411 = vmatprep.subr.bf16.mxu0 %v756_v43  ;;  %v704_v46 = vld [vmem:[%s822_s5 + $0x18] sm:$0xff]   ;;  %s308_s13 = scalar_lea.vmem [#allocation2], %s633_s11  ;;  %v705_v48 = vld [vmem:[%s822_s5 + $0x20] sm:$0xff]   ;;  %v706_v49 = vld [vmem:[%s822_s5 + $0x28] sm:$0xff]   ;;  %p627_p8 = scmp.ne.s32.totalorder %s735_s12, 2 }
  0x9f   : > { %412 = vmatpush1.bf16.msra.mxu0 %v701_v42  ;;  %v707_v50 = vld [vmem:[%s822_s5 + $0x30] sm:$0xff]   ;;  %v708_v51 = vld [vmem:[%s822_s5 + $0x38] sm:$0xff]   ;;  %v709_v52 = vld [vmem:[%s822_s5 + $0x40] sm:$0xff]  }
  0xa0   : > { %413 = vmatprep.subr.bf16.mxu0 %v756_v43  ;;  %v710_v53 = vld [vmem:[%s822_s5 + $0x48] sm:$0xff]   ;;  %v711_v54 = vld [vmem:[%s822_s5 + $0x50] sm:$0xff]   ;;  %v712_v55 = vld [vmem:[%s822_s5 + $0x58] sm:$0xff]  }
  0xa1   : > { %v304_v57 = vld [vmem:[#allocation3] sm:$0xff]  ;;  %v305_v59 = vld [vmem:[#allocation3 + $0x8] sm:$0xff] }
  0xa3   : > { %414 = vmatpush1.bf16.msra.mxu0 %v702_v44  ;;  %v310_v47 = vld [vmem:[%s308_s13 + $0x8] sm:$0xff]  ;;  %v309_v56 = vld [vmem:[%s308_s13] sm:$0xff] }
  0xa4   : > { %415 = vmatprep.subr.bf16.mxu0 %v756_v43  ;;  %626 = vmatprep.mubr.msk.bf16.mxu0 %vm407_vm3, %v310_v47 }
  0xa7   : > { %416 = vmatpush1.bf16.msra.mxu0 %v703_v45 }
  0xa8   : > { %417 = vmatprep.subr.bf16.mxu0 %v756_v43 }
  0xab   : > { %418 = vmatpush1.bf16.msra.mxu0 %v704_v46 }
  0xac   : > { %419 = vmatprep.subr.bf16.mxu0 %v756_v43 }
  0xaf   : > { %420 = vmatpush1.bf16.msra.mxu0 %v705_v48 }
  0xb0   : > { %421 = vmatprep.subr.bf16.mxu0 %v756_v43 }
  0xb3   : > { %422 = vmatpush1.bf16.msra.mxu0 %v706_v49 }
  0xb4   : > { %423 = vmatprep.subr.bf16.mxu0 %v756_v43 }
  0xb7   : > { %424 = vmatpush1.bf16.msra.mxu0 %v707_v50 }
  0xb8   : > { %425 = vmatprep.subr.bf16.mxu0 %v756_v43 }
  0xbb   : > { %426 = vmatpush1.bf16.msra.mxu0 %v708_v51 }
  0xbc   : > { %427 = vmatprep.subr.bf16.mxu0 %v756_v43 }
  0xbf   : > { %428 = vmatpush1.bf16.msra.mxu0 %v709_v52 }
  0xc0   : > { %429 = vmatprep.subr.bf16.mxu0 %v756_v43 }
  0xc3   : > { %430 = vmatpush1.bf16.msra.mxu0 %v710_v53 }
  0xc4   : > { %431 = vmatprep.subr.bf16.mxu0 %v756_v43 }
  0xc7   : > { %432 = vmatpush1.bf16.msra.mxu0 %v711_v54 }
  0xc8   : > { %433 = vmatprep.subr.bf16.mxu0 %v756_v43 }
  0xcb   : > { %434 = vmatpush1.bf16.msra.mxu0 %v712_v55 }
  0xce   : > { %444 = vmatmul.mubr.bf16.vlgmr.msra.gmra.mrb[0].mxu0 %v309_v56 }
 0x1a0   : > { %459 = sbr.rel (%p627_p8) target bundleno = 447 (0x1bf), region = 36 }
 0x1a1   : > { %v445_v58 = vpop.f32.mrb[0].mxu0 }
 0x1a2   : > { %v452_v60 = vadd.f32 %v445_v58, %v304_v57  ;;  %v447_v61 = vpop.f32.mrb[1].mxu0 }
 0x1a3   : > { %v448_v62 = vpop.f32.mrb[2].mxu0 }
 0x1a4   : > { %454 = vst [vmem:[#allocation3] sm:$0xff] %v452_v60  ;;  %v453_v63 = vadd.f32 %v448_v62, %v305_v59  ;;  %v450_v0 = vpop.f32.mrb[3].mxu0 }
 0x1a6   : > { %455 = vst [vmem:[#allocation3 + $0x8] sm:$0xff] %v453_v63 }
 0x1ab   : > { %v460_v1 = vld [vmem:[#allocation3] sm:$0xff] }
 0x1ac   : > { %v480_v5 = vmul.f32 %v460_v1, %v460_v1 }
 0x1ad   : > { %v461_v2 = vld [vmem:[#allocation3 + $0x8] sm:$0xff] }
 0x1ae   : > { %v643_v3 = vpack.c.bf16 %v461_v2, %v460_v1  ;;  %v472_v4 = vadd.f32 %v461_v2, %v460_v1  ;;  %v481_v6 = vmul.f32 %v461_v2, %v461_v2 }
 0x1b0   : > { %644 = vst [vmem:[%s814_s25] sm:$0xff] %v643_v3   ;;  %v473_v7 = vrot.slane %v472_v4, 4  ;;  %v482_v8 = vadd.f32 %v481_v6, %v480_v5 }
 0x1b2   : > { %v474_v9 = vadd.f32 %v473_v7, %v472_v4  ;;  %v483_v10 = vrot.slane %v482_v8, 4 }
 0x1b4   : > { %v475_v11 = vrot.slane %v474_v9, 2  ;;  %v484_v12 = vadd.f32 %v483_v10, %v482_v8 }
 0x1b6   : > { %v476_v13 = vadd.f32 %v475_v11, %v474_v9  ;;  %v485_v14 = vrot.slane %v484_v12, 2 }
 0x1b8   : > { %v477_v15 = vrot.slane %v476_v13, 1  ;;  %v486_v16 = vadd.f32 %v485_v14, %v484_v12 }
 0x1ba   : > { %v478_v17 = vadd.f32 %v477_v15, %v476_v13  ;;  %v487_v18 = vrot.slane %v486_v16, 1 }
 0x1bc   : > { %479 = vst [vmem:[%s827_s8] sm:$0x1] %v478_v17  ;;  %v488_v19 = vadd.f32 %v487_v18, %v486_v16 }
 0x1be   : > { %489 = vst [vmem:[%s827_s8 + $0x1] sm:$0x1] %v488_v19 }
 0x1bf PF: > { %s14_s16 = sadd.s32 1, %s751_s16   ;;  %s874_s12 = smov %s743_s14 }
 0x1c0   : > { %p11_p9 = scmp.ge.s32.totalorder %s14_s16, 8   ;;  %s875_s13 = smov %s747_s15 }
 0x1c1   : > { %s876_s14 = smov %s879_s17  ;;  %s877_s15 = smov %s883_s18 }
 0x1c2   :  { %13 = sbr.rel (!%p11_p9) target bundleno = 3 (0x3), region = 84 }

</bundles_post_ra>
